<compile_context>
chip_gen: v7x
topology: tpu7x:2x2x1
jax: 0.10.0
libtpu: 0.0.40
codegen_flags: <defaults>
</compile_context>

<pallas_src>
import jax
import jax.numpy as jnp
from jax import lax
from jax.experimental import pallas as pl
from jax.experimental.pallas import tpu as pltpu

_SUBLANES = 8
_LANES = 128
_PER_BUFFER_VMEM_BYTES = 8 * 1024 * 1024   # per (double-buffered) x input buffer
_VMEM_LIMIT_BYTES = 32 * 1024 * 1024       # <= scoped limits on v5e/v6e/v7x


def _round_up(value: int, multiple: int) -> int:
    return ((value + multiple - 1) // multiple) * multiple


def _atomic_energies_kernel(x_ref, w_ref, o_ref):
    # x_ref: (tm, K) tile of packed nodes (P nodes per lane row, K = P*E lanes)
    # w_ref: (P_pad, K) block-structured energies (row g: energies at lanes g*E..)
    # o_ref: (P_pad, tm) lane-dense output block; o[g, m] = energy of node m*P + g.
    o_ref[...] = lax.dot_general(
        w_ref[...],
        x_ref[...],
        dimension_numbers=(((1,), (1,)), ((), ())),  # contract K (rhs last dim -> MXU NT path)
        preferred_element_type=jnp.float32,          # f32 accumulation on the MXU
    ).astype(o_ref.dtype)


def atomic_energies_block(x: jax.Array, atomic_energies: jax.Array, *, tm: int = 8192) -> jax.Array:
    """Equivalent of AtomicEnergiesBlock.forward: x @ atleast_2d(atomic_energies).T

    x: [..., E], atomic_energies: [E]  ->  out: [..., 1]
    """
    atomic_energies = jnp.asarray(atomic_energies).reshape(-1)
    E = atomic_energies.shape[0]
    assert x.shape[-1] == E, "last dim of x must match number of atomic energies"

    lead = x.shape[:-1]
    x2d = x.reshape(-1, E)
    N = x2d.shape[0]
    if N == 0:
        return jnp.zeros(lead + (1,), dtype=x.dtype)

    dt = x.dtype
    itemsize = jnp.dtype(dt).itemsize

    # --- lane packing: P nodes per 128-lane row ------------------------------
    P = max(1, _LANES // E)
    K = P * E
    M = pl.cdiv(N, P)          # number of packed groups (rows of the packed array)
    n_pad = M * P
    if n_pad != N:
        # Only the ragged tail (< P rows) needs zeros; callers with P-divisible
        # N skip this (XLA-materialized) pad entirely.
        x2d = jnp.pad(x2d, ((0, n_pad - N), (0, 0)))
    xp = x2d.reshape(M, K)     # free reshape: row m holds nodes m*P .. m*P+P-1

    # Block-structured energy matrix W[g, g*E + e] = energies[e]; rows are
    # padded with zeros up to one sublane group so no matmul dim is tiny.
    P_pad = max(P, _SUBLANES)
    w = (jnp.eye(P_pad, P, dtype=dt)[:, :, None]
         * atomic_energies.astype(dt).reshape(1, 1, E)).reshape(P_pad, K)

    # --- tile sizing ----------------------------------------------------------
    row_bytes = _round_up(K, _LANES) * itemsize          # lane-padded VMEM row
    max_tm = max(_LANES, (_PER_BUFFER_VMEM_BYTES // row_bytes) // _LANES * _LANES)
    tm_eff = min(_round_up(max(tm, 1), _LANES), _round_up(M, _LANES), max_tm)
    if M > _LANES:
        # Prefer >= 2 grid tiles: shards the "parallel" grid across v7x's two
        # TensorCores and gives the double-buffer pipeline overlap.
        tm_eff = min(tm_eff, _round_up(pl.cdiv(M, 2), _LANES))
    num_tiles = pl.cdiv(M, tm_eff)
    out_cols = num_tiles * tm_eff

    cost = pl.CostEstimate(
        flops=2 * out_cols * K * P_pad,
        transcendentals=0,
        bytes_accessed=M * K * itemsize + P_pad * K * itemsize
        + P_pad * out_cols * itemsize,
    )

    slab = pl.pallas_call(
        _atomic_energies_kernel,
        out_shape=jax.ShapeDtypeStruct((P_pad, out_cols), dt),
        grid_spec=pltpu.PrefetchScalarGridSpec(
            num_scalar_prefetch=0,
            grid=(num_tiles,),
            in_specs=[
                pl.BlockSpec((tm_eff, K), lambda i: (i, 0)),   # packed node tile (ragged tail OK)
                pl.BlockSpec((P_pad, K), lambda i: (0, 0)),    # energies, VMEM resident
            ],
            out_specs=pl.BlockSpec((P_pad, tm_eff), lambda i: (0, i)),
        ),
        compiler_params=pltpu.CompilerParams(
            dimension_semantics=("parallel",),
            vmem_limit_bytes=_VMEM_LIMIT_BYTES,
        ),
        cost_estimate=cost,
    )(xp, w)

    # slab[g, m] = energy of node m*P + g.  Columns >= M are ragged-tail garbage
    # and rows >= P come from the zero-padded W rows -> slice both off, then a
    # small (P, M) transpose restores node order.
    out_nodes = slab[:P, :M].T.reshape(n_pad)[:N]
    return out_nodes.reshape(lead + (1,))


if __name__ == "__main__":
    key = jax.random.PRNGKey(0)
    k_e1, k_x1, k_e2, k_x2 = jax.random.split(key, 4)

    # Inputs are quantized to bf16-representable f32 so the check is exact
    # regardless of the MXU's f32 matmul precision mode.

    # Case 1: E = 16 (packs to exactly K = 128 lanes, P = 8), batched input
    # whose node count (74) is not a multiple of P -> exercises the tail pad.
    E1 = 16
    e1 = (jax.random.normal(k_e1, (E1,), dtype=jnp.float32)
          .astype(jnp.bfloat16).astype(jnp.float32))
    x1 = (jax.random.uniform(k_x1, (2, 37, E1), dtype=jnp.float32)
          .astype(jnp.bfloat16).astype(jnp.float32))
    out1 = jax.block_until_ready(atomic_energies_block(x1, e1))
    ref1 = x1 @ e1[:, None]
    assert out1.shape == (2, 37, 1), out1.shape
    assert jnp.allclose(out1, ref1, atol=1e-4, rtol=1e-4), "mismatch vs reference (case 1)"

    # Case 2: E = 48 (P = 2, K = 96 < 128: exercises the lane-padded
    # contraction and zero-padded W rows) with a small explicit tile ->
    # multi-step grid with a ragged last packed block.
    E2 = 48
    e2 = (jax.random.normal(k_e2, (E2,), dtype=jnp.float32)
          .astype(jnp.bfloat16).astype(jnp.float32))
    x2 = (jax.random.uniform(k_x2, (300, E2), dtype=jnp.float32)
          .astype(jnp.bfloat16).astype(jnp.float32))
    out2 = jax.block_until_ready(atomic_energies_block(x2, e2, tm=128))
    ref2 = x2 @ e2[:, None]
    assert out2.shape == (300, 1), out2.shape
    assert jnp.allclose(out2, ref2, atol=1e-4, rtol=1e-4), "mismatch vs reference (case 2)"

    print("KERNEL_OK")
</pallas_src>

<mosaic_0001>
module attributes {stable_mosaic.version = 11 : i64} {
  func.func @_atomic_energies_kernel(%arg0: i32, %arg1: memref<128x128xf32, #tpu.memory_space<vmem>>, %arg2: memref<8x128xf32, #tpu.memory_space<vmem>>, %arg3: memref<8x128xf32, #tpu.memory_space<vmem>>) attributes {dimension_semantics = [#tpu.dimension_semantics<parallel>], iteration_bounds = array<i64: 1>, scalar_prefetch = 0 : i64, scratch_operands = 0 : i64, tpu.core_type = #tpu.core_type<tc>, window_params = [{transform_indices = @transform_0, window_bounds = array<i64: 128, 128>}, {pipeline_mode = #tpu.pipeline_mode<synchronous>, transform_indices = @transform_1, window_bounds = array<i64: 8, 128>}, {transform_indices = @transform_2, window_bounds = array<i64: 8, 128>}]} {
    %c0 = arith.constant 0 : index
    %c0_0 = arith.constant 0 : index
    %0 = vector.load %arg2[%c0, %c0_0] : memref<8x128xf32, #tpu.memory_space<vmem>>, vector<8x128xf32>
    %c0_1 = arith.constant 0 : index
    %c0_2 = arith.constant 0 : index
    %1 = vector.load %arg1[%c0_1, %c0_2] : memref<128x128xf32, #tpu.memory_space<vmem>>, vector<128x128xf32>
    %cst = arith.constant dense<0.000000e+00> : vector<8x128xf32>
    %2 = tpu.matmul %0, %1, %cst {dimension_numbers = #tpu.dot_dimension_numbers<[1], [1], [0], [0], [0, 0, 1, 0], [], []>} : vector<8x128xf32>, vector<128x128xf32>, vector<8x128xf32> -> vector<8x128xf32>
    %c0_3 = arith.constant 0 : index
    %c0_4 = arith.constant 0 : index
    %3 = vector.load %arg3[%c0_3, %c0_4] : memref<8x128xf32, #tpu.memory_space<vmem>>, vector<8x128xf32>
    tpu.vector_store %arg3[%c0_3, %c0_4], %2 {strides = array<i32>} : memref<8x128xf32, #tpu.memory_space<vmem>>, vector<8x128xf32>,
    return
  }
  func.func @transform_0(%arg0: i32) -> (i32, i32) {
    %c0_i32 = arith.constant 0 : i32
    %c0_i32_0 = arith.constant 0 : i32
    return %arg0, %c0_i32 : i32, i32
  }
  func.func @transform_1(%arg0: i32) -> (i32, i32) {
    %c0_i32 = arith.constant 0 : i32
    %c0_i32_0 = arith.constant 0 : i32
    %c0_i32_1 = arith.constant 0 : i32
    return %c0_i32, %c0_i32_0 : i32, i32
  }
  func.func @transform_2(%arg0: i32) -> (i32, i32) {
    %c0_i32 = arith.constant 0 : i32
    %c0_i32_0 = arith.constant 0 : i32
    return %c0_i32, %arg0 : i32, i32
  }
}

</mosaic_0001>

<bundles_post_ra>
// kernel: tpu_custom_call.1
= control target key start
LH: loop header
LB: loop body
LE: loop exit
PB: predicated region body
PF: predicated region fallthrough
CT: control target
= control target key end

     0   :  { %7 = vsyncpa [#allocation3], 0  ;;  %s357_s0 = inlined_call_operand.hbm [shape: f32[10,128], index: 0, kind: input, shape index: {}]   ;;  %s358_s1 = inlined_call_operand.hbm [shape: f32[8,128], index: 1, kind: input, shape index: {}]   ;;  %s359_s2 = inlined_call_operand.hbm [shape: f32[8,128], index: 2, kind: output, shape index: {}]  }
   0x1   :  { %8 = vsyncpa [#allocation6], 0 }
   0x2   :  { %9 = vsyncpa [#allocation4], 0 }
   0x3   :  { %14 = vsyncadd [#allocation3], 1792  ;;  %s298_s9 = smov [#allocation2]   ;;  %s226_s13 = scalar_lea.hbm %s357_s0, 256 }
   0x4   :  { %s15_s10 = sshll.u32 %s298_s9, 4  ;;  %p227_p0 = scmp.ne.s32.totalorder %s357_s0, %s226_s13  ;;  %s16_s10 = int_to_ptr.vmem [resolvable:$true] %s15_s10 }
   0x5   :  { %p230_p1 = scmp.lt.u32.totalorder %s226_s13, %s357_s0 }
   0x7   :  { %p232_p2 = pnand %p230_p1, %p227_p0 }
   0x9   :  { %235 = shalt.err (!%p232_p2)
}
   0xa   :  { %s236_s18 = scalar_lea.vmem %s16_s10, 256  ;;  %s240_s19 = scalar_lea.vmem %s16_s10, 2048 }
   0xb   :  { %p237_p3 = scmp.ne.s32.totalorder %s16_s10, %s236_s18  ;;  %p241_p4 = scmp.lt.s32.totalorder %s16_s10, %s16_s10 }
   0xc   :  { %p242_p5 = scmp.lt.s32.totalorder %s240_s19, %s236_s18 }
   0xe   :  { %p243_p6 = por %p242_p5, %p241_p4 }
  0x10   :  { %p244_p7 = pnand %p243_p6, %p237_p3 }
  0x12   :  { %247 = shalt.err (!%p244_p7)
}
  0x13   :  { %s299_s20 = smov 128   ;;  %s300_s21 = smov 8  }
  0x14   :  { %21 = dma.hbm_to_vmem [thread:$0]  %s357_s0, 256, %s16_s10, [#allocation3], %s299_s20, %s299_s20, %s300_s21  }
  0x15   :  { %s301_s24 = smov [#allocation5]   ;;  %s248_s28 = scalar_lea.hbm %s358_s1, 128 }
  0x16   :  { %s28_s25 = sshll.u32 %s301_s24, 4  ;;  %p249_p8 = scmp.ne.s32.totalorder %s358_s1, %s248_s28  ;;  %s29_s25 = int_to_ptr.vmem [resolvable:$true] %s28_s25 }
  0x17   :  { %p252_p9 = scmp.lt.u32.totalorder %s248_s28, %s358_s1 }
  0x19   :  { %p254_p10 = pnand %p252_p9, %p249_p8 }
  0x1b   :  { %257 = shalt.err (!%p254_p10)
}
  0x1c   :  { %s258_s5 = scalar_lea.vmem %s29_s25, 128  ;;  %p263_p12 = scmp.lt.s32.totalorder %s29_s25, %s29_s25 }
  0x1d   :  { %p259_p11 = scmp.ne.s32.totalorder %s29_s25, %s258_s5  ;;  %p264_p13 = scmp.lt.s32.totalorder %s258_s5, %s258_s5 }
  0x1f   :  { %p265_p0 = por %p264_p13, %p263_p12 }
  0x21   :  { %p266_p1 = pnand %p265_p0, %p259_p11 }
  0x23   :  { %269 = shalt.err (!%p266_p1)
}
  0x24   :  { %31 = dma.hbm_to_vmem [thread:$0]  %s358_s1, 128, %s29_s25, [#allocation6]  }
  0x25   :  { %292 = dma.done.wait [#allocation3], 2048  }
  0x26   :  { %293 = vsyncadd [#allocation3], 4294965248 }
  0x27   :  { %294 = dma.done.wait [#allocation6], 128  }
  0x28   :  { %295 = vsyncadd [#allocation6], 4294967168  ;;  %v302_v0 = vmov 0.0|0.0   ;;  %vm303_vm0 = vmmov 0   ;;  %v304_v1 = vmov 0.0   ;;  %v39_v2 = vld [vmem:[#allocation2] sm:$0xff] }
  0x29   :  { %194 = vmatprep.subr.bf16.mxu0 %v302_v0  ;;  %191 = vmatprep.mubr.msk.f32.mxu0 %vm303_vm0, %v304_v1  ;;  %v40_v3 = vld [vmem:[#allocation2 + $0x8] sm:$0xff]  ;;  %v41_v5 = vld [vmem:[#allocation2 + $0x10] sm:$0xff]  ;;  %v42_v6 = vld [vmem:[#allocation2 + $0x18] sm:$0xff]  ;;  %s305_s1 = smov [#allocation7]  }
  0x2a   :  { %v195_v4 = vpack.c.bf16 %v40_v3, %v39_v2  ;;  %v198_v7 = vpack.c.bf16 %v42_v6, %v41_v5  ;;  %v43_v8 = vld [vmem:[#allocation2 + $0x20] sm:$0xff]  ;;  %v44_v9 = vld [vmem:[#allocation2 + $0x28] sm:$0xff]  ;;  %v45_v11 = vld [vmem:[#allocation2 + $0x30] sm:$0xff]  ;;  %s132_s7 = sshll.u32 %s305_s1, 4  ;;  %s133_s7 = int_to_ptr.vmem [resolvable:$true] %s132_s7 }
  0x2b   :  { %v201_v10 = vpack.c.bf16 %v44_v9, %v43_v8  ;;  %v46_v12 = vld [vmem:[#allocation2 + $0x38] sm:$0xff]  ;;  %v47_v14 = vld [vmem:[#allocation2 + $0x40] sm:$0xff]  ;;  %v48_v15 = vld [vmem:[#allocation2 + $0x48] sm:$0xff]  ;;  %s270_s8 = scalar_lea.vmem %s133_s7, 128  ;;  %p275_p3 = scmp.lt.s32.totalorder %s133_s7, %s133_s7 }
  0x2c   :  { %196 = vmatpush3.bf16.xpose.msra.mxu0 %v195_v4  ;;  %v204_v13 = vpack.c.bf16 %v46_v12, %v45_v11  ;;  %v207_v16 = vpack.c.bf16 %v48_v15, %v47_v14  ;;  %v49_v17 = vld [vmem:[#allocation2 + $0x50] sm:$0xff]  ;;  %v50_v18 = vld [vmem:[#allocation2 + $0x58] sm:$0xff]  ;;  %v51_v20 = vld [vmem:[#allocation2 + $0x60] sm:$0xff]  ;;  %p271_p2 = scmp.ne.s32.totalorder %s133_s7, %s270_s8  ;;  %p276_p4 = scmp.lt.s32.totalorder %s270_s8, %s270_s8 }
  0x2d   :  { %197 = vmatprep.subr.bf16.mxu0 %v302_v0  ;;  %v210_v19 = vpack.c.bf16 %v50_v18, %v49_v17  ;;  %v52_v21 = vld [vmem:[#allocation2 + $0x68] sm:$0xff]  ;;  %v53_v23 = vld [vmem:[#allocation2 + $0x70] sm:$0xff]  ;;  %v54_v24 = vld [vmem:[#allocation2 + $0x78] sm:$0xff] }
  0x2e   :  { %v213_v22 = vpack.c.bf16 %v52_v21, %v51_v20  ;;  %v216_v25 = vpack.c.bf16 %v54_v24, %v53_v23  ;;  %v38_v26 = vld [vmem:[#allocation5] sm:$0xff]  ;;  %p277_p5 = por %p276_p4, %p275_p3 }
  0x30   :  { %p278_p6 = pnand %p277_p5, %p271_p2 }
  0x34   :  { %199 = vmatpush3.bf16.xpose.msra.mxu0 %v198_v7 }
  0x35   :  { %200 = vmatprep.subr.bf16.mxu0 %v302_v0 }
  0x3c   :  { %202 = vmatpush3.bf16.xpose.msra.mxu0 %v201_v10 }
  0x3d   :  { %203 = vmatprep.subr.bf16.mxu0 %v302_v0 }
  0x44   :  { %205 = vmatpush3.bf16.xpose.msra.mxu0 %v204_v13 }
  0x45   :  { %206 = vmatprep.subr.bf16.mxu0 %v302_v0 }
  0x4c   :  { %208 = vmatpush3.bf16.xpose.msra.mxu0 %v207_v16 }
  0x4d   :  { %209 = vmatprep.subr.bf16.mxu0 %v302_v0 }
  0x54   :  { %211 = vmatpush3.bf16.xpose.msra.mxu0 %v210_v19 }
  0x55   :  { %212 = vmatprep.subr.bf16.mxu0 %v302_v0 }
  0x5c   :  { %214 = vmatpush3.bf16.xpose.msra.mxu0 %v213_v22 }
  0x5d   :  { %215 = vmatprep.subr.bf16.mxu0 %v302_v0 }
  0x64   :  { %217 = vmatpush3.bf16.xpose.msra.mxu0 %v216_v25 }
  0x6b   :  { %192 = vmatmul.mubr.f32.vlgmr.msra.gmra.mrb[0].mxu0 %v38_v26 }
 0x13e   :  { %v121_v27 = vpop.f32.mrb[0].mxu0 }
 0x13f   :  { %125 = vst [vmem:[#allocation7] sm:$0xff] %v121_v27  ;;  %v193_v28 = vpop.f32.mrb[1].mxu0 }
 0x140   :  { %281 = shalt.err (!%p278_p6)
}
 0x141   :  { %s282_s11 = scalar_lea.hbm %s359_s2, 128 }
 0x142   :  { %p283_p7 = scmp.ne.s32.totalorder %s359_s2, %s282_s11  ;;  %p286_p8 = scmp.lt.u32.totalorder %s282_s11, %s359_s2 }
 0x144   :  { %p288_p9 = pnand %p286_p8, %p283_p7 }
 0x146   :  { %291 = shalt.err (!%p288_p9)
}
 0x147   :  { %135 = dma.vmem_to_hbm [thread:$0]  %s133_s7, 128, %s359_s2, [#allocation4]  }
 0x148   :  { %296 = dma.done.wait [#allocation4], 128  }
 0x149   :  { %297 = vsyncadd [#allocation4], 4294967168 }
 0x14a   :  { %139 = vsyncpa [#allocation3], 1 }
 0x14b   :  { %140 = vsyncpa [#allocation6], 1 }
 0x14c   :  { %141 = vsyncpa [#allocation4], 1 }

</bundles_post_ra>
